<compile_context>
chip_gen: v6e
topology: v6e:2x2x1
jax: 0.10.0
libtpu: 0.0.40
codegen_flags: <defaults>
</compile_context>

<pallas_src>
import functools

import jax
import jax.numpy as jnp
from jax.experimental import pallas as pl
from jax.experimental.pallas import tpu as pltpu

HIDDEN = 256          # per-head hidden width (PyTorch spec)
FUSED = 2 * HIDDEN    # both heads fused along the feature axis


# ----------------------------- Pallas kernel --------------------------------
def critic_kernel(s_ref, a_ref,
                  ws1_ref, wa1_ref, b1_ref,      # fused layer 1 (both heads)
                  w2_ref, b2_ref,                # head-1 layer 2
                  w5_ref, b5_ref,                # head-2 layer 2
                  w3_ref, b3_ref,                # fused (block-diag) layer 3
                  out_ref):
    s = s_ref[...]                                # (TB, S)  bf16
    a = a_ref[...]                                # (TB, A)  bf16

    # Fused layer 1 for both heads: (TB, 512) = s@Ws + a@Wa + b, f32 accumulate.
    z1 = (jnp.dot(s, ws1_ref[...], preferred_element_type=jnp.float32)
          + jnp.dot(a, wa1_ref[...], preferred_element_type=jnp.float32)
          + b1_ref[...])
    hg = jnp.maximum(z1, 0.0).astype(jnp.bfloat16)
    h1 = hg[:, :HIDDEN]                           # head-1 activations
    g1 = hg[:, HIDDEN:]                           # head-2 activations

    # Layer 2 per head.
    h2 = jnp.maximum(
        jnp.dot(h1, w2_ref[...], preferred_element_type=jnp.float32) + b2_ref[...],
        0.0).astype(jnp.bfloat16)
    g2 = jnp.maximum(
        jnp.dot(g1, w5_ref[...], preferred_element_type=jnp.float32) + b5_ref[...],
        0.0).astype(jnp.bfloat16)

    # Fused layer 3: (TB, 512) @ block-diag(512, 2) + (1, 2) -> packed (TB, 2) output.
    hg2 = jnp.concatenate([h2, g2], axis=-1)
    out_ref[...] = (jnp.dot(hg2, w3_ref[...], preferred_element_type=jnp.float32)
                    + b3_ref[...])


# ------------------------------ Parameters ----------------------------------
def init_linear_params(key, fan_in, fan_out):
    """Mimics torch.nn.Linear default init: U(-1/sqrt(fan_in), +1/sqrt(fan_in))."""
    kw, kb = jax.random.split(key)
    bound = 1.0 / jnp.sqrt(jnp.float32(fan_in))
    w = jax.random.uniform(kw, (fan_in, fan_out), jnp.float32, -bound, bound)
    b = jax.random.uniform(kb, (1, fan_out), jnp.float32, -bound, bound)
    return w, b


def init_critic_params(key, state_dim, action_dim, hidden=HIDDEN):
    in_dim = state_dim + action_dim
    keys = jax.random.split(key, 6)
    w1, b1 = init_linear_params(keys[0], in_dim, hidden)
    w2, b2 = init_linear_params(keys[1], hidden, hidden)
    w3, b3 = init_linear_params(keys[2], hidden, 1)
    w4, b4 = init_linear_params(keys[3], in_dim, hidden)
    w5, b5 = init_linear_params(keys[4], hidden, hidden)
    w6, b6 = init_linear_params(keys[5], hidden, 1)
    return (w1, b1, w2, b2, w3, b3, w4, b4, w5, b5, w6, b6)


def make_fused_params(params, state_dim):
    """Repack the 6 PyTorch-style Linear layers into the fused kernel layout."""
    w1, b1, w2, b2, w3, b3, w4, b4, w5, b5, w6, b6 = params
    # Layer 1: split inputs (state / action), concat the two heads along outputs.
    ws = jnp.concatenate([w1[:state_dim], w4[:state_dim]], axis=1)   # (S, 512)
    wa = jnp.concatenate([w1[state_dim:], w4[state_dim:]], axis=1)   # (A, 512)
    b1f = jnp.concatenate([b1, b4], axis=1)                          # (1, 512)
    # Layer 3: block-diagonal (512, 2) so both q-values come out of one matmul.
    zero = jnp.zeros_like(w3)
    w3f = jnp.concatenate([jnp.concatenate([w3, zero], axis=1),
                           jnp.concatenate([zero, w6], axis=1)], axis=0)  # (512, 2)
    b3f = jnp.concatenate([b3, b6], axis=1)                               # (1, 2)
    bf16 = jnp.bfloat16
    return (ws.astype(bf16), wa.astype(bf16), b1f,
            w2.astype(bf16), b2,
            w5.astype(bf16), b5,
            w3f.astype(bf16), b3f)


# ------------------------------- Wrapper -------------------------------------
@functools.partial(jax.jit, static_argnames=("block_b",))
def critic_forward(state, action, fused_params, block_b=512):
    B, S = state.shape
    A = action.shape[1]
    s = state.astype(jnp.bfloat16)
    a = action.astype(jnp.bfloat16)

    ws, wa, b1f, w2, b2, w5, b5, w3f, b3f = fused_params

    # Small batches: one block covering the whole batch (full-extent dims are legal
    # even when B is not a multiple of 8).  Large batches: tile over the batch.
    tb = B if B <= block_b else block_b
    grid = (pl.cdiv(B, tb),)

    batch_map = lambda i: (i, 0)
    whole_map = lambda i: (0, 0)

    in_specs = [
        pl.BlockSpec((tb, S), batch_map),
        pl.BlockSpec((tb, A), batch_map),
        pl.BlockSpec(ws.shape, whole_map),
        pl.BlockSpec(wa.shape, whole_map),
        pl.BlockSpec(b1f.shape, whole_map),
        pl.BlockSpec(w2.shape, whole_map),
        pl.BlockSpec(b2.shape, whole_map),
        pl.BlockSpec(w5.shape, whole_map),
        pl.BlockSpec(b5.shape, whole_map),
        pl.BlockSpec(w3f.shape, whole_map),
        pl.BlockSpec(b3f.shape, whole_map),
    ]
    out_specs = pl.BlockSpec((tb, 2), batch_map)

    q = pl.pallas_call(
        critic_kernel,
        out_shape=jax.ShapeDtypeStruct((B, 2), jnp.float32),
        grid=grid,
        in_specs=in_specs,
        out_specs=out_specs,
        compiler_params=pltpu.CompilerParams(
            dimension_semantics=("parallel",)),
    )(s, a, ws, wa, b1f, w2, b2, w5, b5, w3f, b3f)

    return q[:, 0:1], q[:, 1:2]


# -------------------------------- Main ---------------------------------------
if __name__ == "__main__":
    state_dim, action_dim, batch = 17, 6, 4

    key = jax.random.PRNGKey(0)
    k_state, k_action, k_params = jax.random.split(key, 3)

    state = jax.random.normal(k_state, (batch, state_dim), jnp.float32)
    action = jax.random.normal(k_action, (batch, action_dim), jnp.float32)
    params = init_critic_params(k_params, state_dim, action_dim)
    fused_params = make_fused_params(params, state_dim)

    q1, q2 = critic_forward(state, action, fused_params)
    jax.block_until_ready((q1, q2))
    assert q1.shape == (batch, 1) and q2.shape == (batch, 1)

    # Reference 1: plain-JAX forward with the same bf16-input / f32-accumulate math.
    w1, b1, w2, b2, w3, b3, w4, b4, w5, b5, w6, b6 = params

    def lin_bf16(x, w, b):
        return jnp.dot(x.astype(jnp.bfloat16), w.astype(jnp.bfloat16),
                       preferred_element_type=jnp.float32) + b

    sa = jnp.concatenate([state, action], axis=1)
    h = jnp.maximum(lin_bf16(sa, w1, b1), 0.0)
    h = jnp.maximum(lin_bf16(h, w2, b2), 0.0)
    q1_ref16 = lin_bf16(h, w3, b3)
    g = jnp.maximum(lin_bf16(sa, w4, b4), 0.0)
    g = jnp.maximum(lin_bf16(g, w5, b5), 0.0)
    q2_ref16 = lin_bf16(g, w6, b6)

    assert jnp.allclose(q1, q1_ref16, atol=5e-3, rtol=5e-3)
    assert jnp.allclose(q2, q2_ref16, atol=5e-3, rtol=5e-3)

    # Reference 2: full-f32 PyTorch-equivalent forward (loose tol due to bf16 inputs).
    h = jnp.maximum(sa @ w1 + b1, 0.0)
    h = jnp.maximum(h @ w2 + b2, 0.0)
    q1_ref32 = h @ w3 + b3
    g = jnp.maximum(sa @ w4 + b4, 0.0)
    g = jnp.maximum(g @ w5 + b5, 0.0)
    q2_ref32 = g @ w6 + b6

    assert jnp.allclose(q1, q1_ref32, atol=5e-2, rtol=5e-2)
    assert jnp.allclose(q2, q2_ref32, atol=5e-2, rtol=5e-2)

    print("KERNEL_OK")
</pallas_src>

<mosaic_0001>
module attributes {stable_mosaic.version = 11 : i64} {
  func.func @critic_kernel(%arg0: i32, %arg1: memref<4x17xbf16, #tpu.memory_space<vmem>>, %arg2: memref<4x6xbf16, #tpu.memory_space<vmem>>, %arg3: memref<17x512xbf16, #tpu.memory_space<vmem>>, %arg4: memref<6x512xbf16, #tpu.memory_space<vmem>>, %arg5: memref<1x512xf32, #tpu.memory_space<vmem>>, %arg6: memref<256x256xbf16, #tpu.memory_space<vmem>>, %arg7: memref<1x256xf32, #tpu.memory_space<vmem>>, %arg8: memref<256x256xbf16, #tpu.memory_space<vmem>>, %arg9: memref<1x256xf32, #tpu.memory_space<vmem>>, %arg10: memref<512x2xbf16, #tpu.memory_space<vmem>>, %arg11: memref<1x2xf32, #tpu.memory_space<vmem>>, %arg12: memref<4x2xf32, #tpu.memory_space<vmem>>) attributes {dimension_semantics = [#tpu.dimension_semantics<parallel>], iteration_bounds = array<i64: 1>, scalar_prefetch = 0 : i64, scratch_operands = 0 : i64, tpu.core_type = #tpu.core_type<tc>, window_params = [{transform_indices = @transform_0, window_bounds = array<i64: 4, 17>}, {transform_indices = @transform_1, window_bounds = array<i64: 4, 6>}, {pipeline_mode = #tpu.pipeline_mode<synchronous>, transform_indices = @transform_2, window_bounds = array<i64: 17, 512>}, {pipeline_mode = #tpu.pipeline_mode<synchronous>, transform_indices = @transform_3, window_bounds = array<i64: 6, 512>}, {pipeline_mode = #tpu.pipeline_mode<synchronous>, transform_indices = @transform_4, window_bounds = array<i64: 1, 512>}, {pipeline_mode = #tpu.pipeline_mode<synchronous>, transform_indices = @transform_5, window_bounds = array<i64: 256, 256>}, {pipeline_mode = #tpu.pipeline_mode<synchronous>, transform_indices = @transform_6, window_bounds = array<i64: 1, 256>}, {pipeline_mode = #tpu.pipeline_mode<synchronous>, transform_indices = @transform_7, window_bounds = array<i64: 256, 256>}, {pipeline_mode = #tpu.pipeline_mode<synchronous>, transform_indices = @transform_8, window_bounds = array<i64: 1, 256>}, {pipeline_mode = #tpu.pipeline_mode<synchronous>, transform_indices = @transform_9, window_bounds = array<i64: 512, 2>}, {pipeline_mode = #tpu.pipeline_mode<synchronous>, transform_indices = @transform_10, window_bounds = array<i64: 1, 2>}, {transform_indices = @transform_11, window_bounds = array<i64: 4, 2>}]} {
    %c0 = arith.constant 0 : index
    %c0_0 = arith.constant 0 : index
    %0 = vector.load %arg1[%c0, %c0_0] : memref<4x17xbf16, #tpu.memory_space<vmem>>, vector<4x17xbf16>
    %c0_1 = arith.constant 0 : index
    %c0_2 = arith.constant 0 : index
    %1 = vector.load %arg2[%c0_1, %c0_2] : memref<4x6xbf16, #tpu.memory_space<vmem>>, vector<4x6xbf16>
    %c0_3 = arith.constant 0 : index
    %c0_4 = arith.constant 0 : index
    %2 = vector.load %arg3[%c0_3, %c0_4] : memref<17x512xbf16, #tpu.memory_space<vmem>>, vector<17x512xbf16>
    %cst = arith.constant dense<0.000000e+00> : vector<4x512xf32>
    %3 = tpu.matmul %0, %2, %cst {dimension_numbers = #tpu.dot_dimension_numbers<[1], [0], [0], [1], [0, 0, 1, 1], [], []>} : vector<4x17xbf16>, vector<17x512xbf16>, vector<4x512xf32> -> vector<4x512xf32>
    %c0_5 = arith.constant 0 : index
    %c0_6 = arith.constant 0 : index
    %4 = vector.load %arg4[%c0_5, %c0_6] : memref<6x512xbf16, #tpu.memory_space<vmem>>, vector<6x512xbf16>
    %cst_7 = arith.constant dense<0.000000e+00> : vector<4x512xf32>
    %5 = tpu.matmul %1, %4, %cst_7 {dimension_numbers = #tpu.dot_dimension_numbers<[1], [0], [0], [1], [0, 0, 1, 1], [], []>} : vector<4x6xbf16>, vector<6x512xbf16>, vector<4x512xf32> -> vector<4x512xf32>
    %6 = arith.addf %3, %5 : vector<4x512xf32>
    %c0_8 = arith.constant 0 : index
    %c0_9 = arith.constant 0 : index
    %7 = vector.load %arg5[%c0_8, %c0_9] : memref<1x512xf32, #tpu.memory_space<vmem>>, vector<1x512xf32>
    %8 = vector.broadcast %7 : vector<1x512xf32> to vector<4x512xf32>
    %9 = arith.addf %6, %8 : vector<4x512xf32>
    %cst_10 = arith.constant 0.000000e+00 : f32
    %10 = vector.broadcast %cst_10 : f32 to vector<4x512xf32>
    %11 = arith.maximumf %9, %10 : vector<4x512xf32>
    %12 = arith.truncf %11 : vector<4x512xf32> to vector<4x512xbf16>
    %13 = vector.extract_strided_slice %12 {offsets = [0, 0], sizes = [4, 256], strides = [1, 1]} : vector<4x512xbf16> to vector<4x256xbf16>
    %14 = vector.extract_strided_slice %12 {offsets = [0, 256], sizes = [4, 256], strides = [1, 1]} : vector<4x512xbf16> to vector<4x256xbf16>
    %c0_11 = arith.constant 0 : index
    %c0_12 = arith.constant 0 : index
    %15 = vector.load %arg6[%c0_11, %c0_12] : memref<256x256xbf16, #tpu.memory_space<vmem>>, vector<256x256xbf16>
    %cst_13 = arith.constant dense<0.000000e+00> : vector<4x256xf32>
    %16 = tpu.matmul %13, %15, %cst_13 {dimension_numbers = #tpu.dot_dimension_numbers<[1], [0], [0], [1], [0, 0, 1, 1], [], []>} : vector<4x256xbf16>, vector<256x256xbf16>, vector<4x256xf32> -> vector<4x256xf32>
    %c0_14 = arith.constant 0 : index
    %c0_15 = arith.constant 0 : index
    %17 = vector.load %arg7[%c0_14, %c0_15] : memref<1x256xf32, #tpu.memory_space<vmem>>, vector<1x256xf32>
    %18 = vector.broadcast %17 : vector<1x256xf32> to vector<4x256xf32>
    %19 = arith.addf %16, %18 : vector<4x256xf32>
    %cst_16 = arith.constant 0.000000e+00 : f32
    %20 = vector.broadcast %cst_16 : f32 to vector<4x256xf32>
    %21 = arith.maximumf %19, %20 : vector<4x256xf32>
    %22 = arith.truncf %21 : vector<4x256xf32> to vector<4x256xbf16>
    %c0_17 = arith.constant 0 : index
    %c0_18 = arith.constant 0 : index
    %23 = vector.load %arg8[%c0_17, %c0_18] : memref<256x256xbf16, #tpu.memory_space<vmem>>, vector<256x256xbf16>
    %cst_19 = arith.constant dense<0.000000e+00> : vector<4x256xf32>
    %24 = tpu.matmul %14, %23, %cst_19 {dimension_numbers = #tpu.dot_dimension_numbers<[1], [0], [0], [1], [0, 0, 1, 1], [], []>} : vector<4x256xbf16>, vector<256x256xbf16>, vector<4x256xf32> -> vector<4x256xf32>
    %c0_20 = arith.constant 0 : index
    %c0_21 = arith.constant 0 : index
    %25 = vector.load %arg9[%c0_20, %c0_21] : memref<1x256xf32, #tpu.memory_space<vmem>>, vector<1x256xf32>
    %26 = vector.broadcast %25 : vector<1x256xf32> to vector<4x256xf32>
    %27 = arith.addf %24, %26 : vector<4x256xf32>
    %cst_22 = arith.constant 0.000000e+00 : f32
    %28 = vector.broadcast %cst_22 : f32 to vector<4x256xf32>
    %29 = arith.maximumf %27, %28 : vector<4x256xf32>
    %30 = arith.truncf %29 : vector<4x256xf32> to vector<4x256xbf16>
    %31 = tpu.concatenate %22, %30 in 1 : vector<4x256xbf16>, vector<4x256xbf16> -> vector<4x512xbf16>
    %c0_23 = arith.constant 0 : index
    %c0_24 = arith.constant 0 : index
    %32 = vector.load %arg10[%c0_23, %c0_24] : memref<512x2xbf16, #tpu.memory_space<vmem>>, vector<512x2xbf16>
    %cst_25 = arith.constant dense<0.000000e+00> : vector<4x2xf32>
    %33 = tpu.matmul %31, %32, %cst_25 {dimension_numbers = #tpu.dot_dimension_numbers<[1], [0], [0], [1], [0, 0, 1, 1], [], []>} : vector<4x512xbf16>, vector<512x2xbf16>, vector<4x2xf32> -> vector<4x2xf32>
    %c0_26 = arith.constant 0 : index
    %c0_27 = arith.constant 0 : index
    %34 = vector.load %arg11[%c0_26, %c0_27] : memref<1x2xf32, #tpu.memory_space<vmem>>, vector<1x2xf32>
    %35 = vector.broadcast %34 : vector<1x2xf32> to vector<4x2xf32>
    %36 = arith.addf %33, %35 : vector<4x2xf32>
    %c0_28 = arith.constant 0 : index
    %c0_29 = arith.constant 0 : index
    %37 = vector.load %arg12[%c0_28, %c0_29] : memref<4x2xf32, #tpu.memory_space<vmem>>, vector<4x2xf32>
    tpu.vector_store %arg12[%c0_28, %c0_29], %36 {strides = array<i32>} : memref<4x2xf32, #tpu.memory_space<vmem>>, vector<4x2xf32>,
    return
  }
  func.func @transform_0(%arg0: i32) -> (i32, i32) {
    %c0_i32 = arith.constant 0 : i32
    %c0_i32_0 = arith.constant 0 : i32
    return %arg0, %c0_i32 : i32, i32
  }
  func.func @transform_1(%arg0: i32) -> (i32, i32) {
    %c0_i32 = arith.constant 0 : i32
    %c0_i32_0 = arith.constant 0 : i32
    return %arg0, %c0_i32 : i32, i32
  }
  func.func @transform_2(%arg0: i32) -> (i32, i32) {
    %c0_i32 = arith.constant 0 : i32
    %c0_i32_0 = arith.constant 0 : i32
    %c0_i32_1 = arith.constant 0 : i32
    return %c0_i32, %c0_i32_0 : i32, i32
  }
  func.func @transform_3(%arg0: i32) -> (i32, i32) {
    %c0_i32 = arith.constant 0 : i32
    %c0_i32_0 = arith.constant 0 : i32
    %c0_i32_1 = arith.constant 0 : i32
    return %c0_i32, %c0_i32_0 : i32, i32
  }
  func.func @transform_4(%arg0: i32) -> (i32, i32) {
    %c0_i32 = arith.constant 0 : i32
    %c0_i32_0 = arith.constant 0 : i32
    %c0_i32_1 = arith.constant 0 : i32
    return %c0_i32, %c0_i32_0 : i32, i32
  }
  func.func @transform_5(%arg0: i32) -> (i32, i32) {
    %c0_i32 = arith.constant 0 : i32
    %c0_i32_0 = arith.constant 0 : i32
    %c0_i32_1 = arith.constant 0 : i32
    return %c0_i32, %c0_i32_0 : i32, i32
  }
  func.func @transform_6(%arg0: i32) -> (i32, i32) {
    %c0_i32 = arith.constant 0 : i32
    %c0_i32_0 = arith.constant 0 : i32
    %c0_i32_1 = arith.constant 0 : i32
    return %c0_i32, %c0_i32_0 : i32, i32
  }
  func.func @transform_7(%arg0: i32) -> (i32, i32) {
    %c0_i32 = arith.constant 0 : i32
    %c0_i32_0 = arith.constant 0 : i32
    %c0_i32_1 = arith.constant 0 : i32
    return %c0_i32, %c0_i32_0 : i32, i32
  }
  func.func @transform_8(%arg0: i32) -> (i32, i32) {
    %c0_i32 = arith.constant 0 : i32
    %c0_i32_0 = arith.constant 0 : i32
    %c0_i32_1 = arith.constant 0 : i32
    return %c0_i32, %c0_i32_0 : i32, i32
  }
  func.func @transform_9(%arg0: i32) -> (i32, i32) {
    %c0_i32 = arith.constant 0 : i32
    %c0_i32_0 = arith.constant 0 : i32
    %c0_i32_1 = arith.constant 0 : i32
    return %c0_i32, %c0_i32_0 : i32, i32
  }
  func.func @transform_10(%arg0: i32) -> (i32, i32) {
    %c0_i32 = arith.constant 0 : i32
    %c0_i32_0 = arith.constant 0 : i32
    %c0_i32_1 = arith.constant 0 : i32
    return %c0_i32, %c0_i32_0 : i32, i32
  }
  func.func @transform_11(%arg0: i32) -> (i32, i32) {
    %c0_i32 = arith.constant 0 : i32
    %c0_i32_0 = arith.constant 0 : i32
    return %arg0, %c0_i32 : i32, i32
  }
}

</mosaic_0001>

<bundles_post_ra>
// kernel: critic_forward.1
= control target key start
LH: loop header
LB: loop body
LE: loop exit
PB: predicated region body
PF: predicated region fallthrough
CT: control target
= control target key end

     0   :  { %16 = vsyncpa [#allocation3], 0  ;;  %s1858_s0 = inlined_call_operand.vmem [shape: bf16[4,17], index: 0, kind: input, shape index: {}]   ;;  %s1859_s1 = inlined_call_operand.vmem [shape: bf16[4,6], index: 1, kind: input, shape index: {}]   ;;  %s1860_s2 = inlined_call_operand.hbm [shape: bf16[17,512], index: 2, kind: input, shape index: {}]   ;;  %s1861_s3 = inlined_call_operand.vmem [shape: bf16[6,512], index: 3, kind: input, shape index: {}]   ;;  %s1862_s4 = inlined_call_operand.vmem [shape: f32[1,512], index: 4, kind: input, shape index: {}]   ;;  %s1863_s5 = inlined_call_operand.vmem [shape: bf16[256,256], index: 5, kind: input, shape index: {}]   ;;  %s1864_s6 = inlined_call_operand.vmem [shape: f32[1,256], index: 6, kind: input, shape index: {}]   ;;  %s1865_s7 = inlined_call_operand.hbm [shape: bf16[256,256], index: 7, kind: input, shape index: {}]   ;;  %s1866_s8 = inlined_call_operand.vmem [shape: f32[1,256], index: 8, kind: input, shape index: {}]   ;;  %s1867_s9 = inlined_call_operand.vmem [shape: bf16[512,2], index: 9, kind: input, shape index: {}]   ;;  %s1868_s10 = inlined_call_operand.vmem [shape: f32[1,2], index: 10, kind: input, shape index: {}]   ;;  %s1869_s11 = inlined_call_operand.vmem [shape: f32[4,2], index: 11, kind: output, shape index: {}]  }
   0x1   :  { %17 = vsyncpa [#allocation5], 0  ;;  %s1552_s17 = smov [#allocation2]  }
   0x2   :  { %s27_s18 = sshll.u32 %s1552_s17, 4  ;;  %s28_s18 = int_to_ptr.vmem [resolvable:$true] %s27_s18 }
   0x3   :  { %s1516_s19 = scalar_lea.vmem %s28_s18, 768  ;;  %p1521_p1 = scmp.lt.s32.totalorder %s28_s18, %s28_s18 }
   0x4   :  { %p1517_p0 = scmp.ne.s32.totalorder %s28_s18, %s1516_s19  ;;  %p1522_p2 = scmp.lt.s32.totalorder %s1516_s19, %s1516_s19 }
   0x6   :  { %p1523_p3 = por %p1522_p2, %p1521_p1 }
   0x8   :  { %p1524_p4 = pnand %p1523_p3, %p1517_p0 }
   0xa   :  { %1527 = shalt.err (!%p1524_p4)
}
   0xb   :  { %s1553_s20 = smov 256   ;;  %s1554_s21 = smov 16  }
   0xc   :  { %33 = dma.hbm_to_vmem [thread:$0]  %s1860_s2, 768, %s28_s18, [#allocation3], %s1553_s20, %s1553_s20, %s1554_s21  }
   0xd   :  { %s1555_s24 = smov [#allocation4]  }
   0xe   :  { %s47_s25 = sshll.u32 %s1555_s24, 4  ;;  %s48_s25 = int_to_ptr.vmem [resolvable:$true] %s47_s25 }
   0xf   :  { %s1536_s26 = scalar_lea.vmem %s48_s25, 4096  ;;  %p1541_p6 = scmp.lt.s32.totalorder %s48_s25, %s48_s25 }
  0x10   :  { %p1537_p5 = scmp.ne.s32.totalorder %s48_s25, %s1536_s26  ;;  %p1542_p7 = scmp.lt.s32.totalorder %s1536_s26, %s1536_s26 }
  0x12   :  { %p1543_p8 = por %p1542_p7, %p1541_p6 }
  0x14   :  { %p1544_p9 = pnand %p1543_p8, %p1537_p5 }
  0x16   :  { %1547 = shalt.err (!%p1544_p9)
}
  0x17   :  { %s1556_s27 = smov 128   ;;  %s1557_s28 = smov 8  }
  0x18   :  { %53 = dma.hbm_to_vmem [thread:$0]  %s1865_s7, 4096, %s48_s25, [#allocation5], %s1556_s27, %s1556_s27, %s1557_s28  }
  0x19   :  { %1548 = dma.done.wait [#allocation3], 768  }
  0x1a   :  { %1549 = vsyncadd [#allocation3], 4294966528 }
  0x1b   :  { %1550 = dma.done.wait [#allocation5], 4096  }
  0x1c   :  { %1551 = vsyncadd [#allocation5], 4294963200  ;;  %v1558_v0 = vmov 0   ;;  %vm220_vm0 = vcmask 1040384   ;;  %v75_v1 = vld [vmem:[%s1861_s3] sm:$0x77] }
  0x1d   :  { %136 = vmatprep.mubr.bf16.mxu0 %v1558_v0  ;;  %177 = vmatprep.mubr.bf16.mxu1 %v1558_v0  ;;  %vm91_vm1 = vcmask 1042432   ;;  %v76_v2 = vld [vmem:[%s1861_s3 + $0x8] sm:$0x77]  ;;  %v222_v3 = vsel %vm220_vm0, 65535, %v1558_v0  ;;  %v1201_v4 = vcombine.high %v75_v1, %v75_v1  ;;  %v1200_v6 = vcombine.low %v75_v1, %v75_v1  ;;  %v73_v8 = vld [vmem:[#allocation2 + $0x20] sm:$0x11] }
  0x1e   :  { %v1203_v5 = vcombine.high %v76_v2, %v76_v2  ;;  %v1202_v7 = vcombine.low %v76_v2, %v76_v2  ;;  %v74_v9 = vld [vmem:[#allocation2 + $0x28] sm:$0x11]  ;;  %v1212_v10 = vcombine.low %v73_v8, %v73_v8  ;;  %v1213_v11 = vcombine.high %v73_v8, %v73_v8  ;;  %v68_v16 = vld [vmem:[%s1859_s1] sm:$0x3]  ;;  %v1376_v21 = vld [vmem:[#allocation2 + $0x4] ss:$16 sps:$4 sm:$0xff]  }
  0x1f   :  { %v1214_v12 = vcombine.low %v74_v9, %v74_v9  ;;  %v1215_v13 = vcombine.high %v74_v9, %v74_v9  ;;  %1204 = vmatprep.subr.msk.bf16.mxu0 %vm91_vm1, %v1201_v4  ;;  %v93_v14 = vsel %vm91_vm1, %v1200_v6, 0  ;;  %vm87_vm2 = vcmask 48128   ;;  %v1379_v22 = vld [vmem:[#allocation2 + $0xc] ss:$16 sps:$4 sm:$0xff]   ;;  %v1374_v23 = vld [vmem:[#allocation2] ss:$16 sps:$4 sm:$0xff]  }
  0x20   :  { %1206 = vmatprep.subr.msk.bf16.mxu1 %vm91_vm1, %v1203_v5  ;;  %v99_v15 = vsel %vm91_vm1, %v1202_v7, 0  ;;  %119 = vmatpush1.bf16.msra.mxu0 %v93_v14  ;;  %v227_v17 = vand.u32 %v1213_v11, %v222_v3  ;;  %v224_v19 = vand.u32 %v1212_v10, %v222_v3  ;;  %v1377_v24 = vld [vmem:[#allocation2 + $0x8] ss:$16 sps:$4 sm:$0xff]   ;;  %v1382_v25 = vld [vmem:[%s1863_s5 + $0x74] ss:$8 sps:$4 sm:$0xff]   ;;  %vm216_vm3 = vcmask 138240  }
  0x21   :  { %160 = vmatpush1.bf16.msra.mxu1 %v99_v15  ;;  %v233_v18 = vand.u32 %v1215_v13, %v222_v3  ;;  %v230_v20 = vand.u32 %v1214_v12, %v222_v3  ;;  %v1385_v26 = vld [vmem:[#allocation4 + $0x74] ss:$8 sps:$4 sm:$0xff]   ;;  %v67_v27 = vld [vmem:[%s1858_s0] sm:$0x3]  ;;  %v1380_v28 = vld [vmem:[%s1863_s5 + $0x70] ss:$8 sps:$4 sm:$0xff]  }
  0x22   :  { %247 = vmatprep.subr.bf16.mxu0 %v227_v17  ;;  %v1383_v29 = vld [vmem:[#allocation4 + $0x70] ss:$8 sps:$4 sm:$0xff]   ;;  %v1388_v30 = vld [vmem:[%s1863_s5 + $0x64] ss:$8 sps:$4 sm:$0xff]   ;;  %v1391_v31 = vld [vmem:[#allocation4 + $0x64] ss:$8 sps:$4 sm:$0xff]  }
  0x23   :  { %288 = vmatprep.subr.bf16.mxu1 %v233_v18  ;;  %1205 = vmatmul.mubr.msk.bf16.vlgmr.msra.gmra.mxu0 %vm87_vm2, %v68_v16  ;;  %v1386_v32 = vld [vmem:[%s1863_s5 + $0x60] ss:$8 sps:$4 sm:$0xff]   ;;  %v1389_v33 = vld [vmem:[#allocation4 + $0x60] ss:$8 sps:$4 sm:$0xff]   ;;  %v1394_v34 = vld [vmem:[%s1863_s5 + $0x54] ss:$8 sps:$4 sm:$0xff]  }
  0x24   :  { %1207 = vmatmul.mubr.msk.bf16.vlgmr.msra.gmra.mxu1 %vm87_vm2, %v68_v16  ;;  %248 = vmatpush1.bf16.msra.mxu0 %v224_v19  ;;  %v1397_v35 = vld [vmem:[#allocation4 + $0x54] ss:$8 sps:$4 sm:$0xff]   ;;  %v1392_v36 = vld [vmem:[%s1863_s5 + $0x50] ss:$8 sps:$4 sm:$0xff]   ;;  %v1395_v37 = vld [vmem:[#allocation4 + $0x50] ss:$8 sps:$4 sm:$0xff]  }
  0x25   :  { %289 = vmatpush1.bf16.msra.mxu1 %v230_v20  ;;  %249 = vmatprep.subr.bf16.mxu0 %v1376_v21  ;;  %v1400_v38 = vld [vmem:[%s1863_s5 + $0x44] ss:$8 sps:$4 sm:$0xff]   ;;  %v1403_v39 = vld [vmem:[#allocation4 + $0x44] ss:$8 sps:$4 sm:$0xff]   ;;  %v1398_v40 = vld [vmem:[%s1863_s5 + $0x40] ss:$8 sps:$4 sm:$0xff]  }
  0x26   :  { %290 = vmatprep.subr.bf16.mxu1 %v1379_v22  ;;  %267 = vmatprep.mubr.bf16.mxu0 %v1558_v0  ;;  %v1401_v41 = vld [vmem:[#allocation4 + $0x40] ss:$8 sps:$4 sm:$0xff]   ;;  %v1406_v42 = vld [vmem:[%s1863_s5 + $0x34] ss:$8 sps:$4 sm:$0xff]   ;;  %v1409_v43 = vld [vmem:[#allocation4 + $0x34] ss:$8 sps:$4 sm:$0xff]  }
  0x27   :  { %308 = vmatprep.mubr.bf16.mxu1 %v1558_v0  ;;  %v1404_v44 = vld [vmem:[%s1863_s5 + $0x30] ss:$8 sps:$4 sm:$0xff]   ;;  %v1407_v45 = vld [vmem:[#allocation4 + $0x30] ss:$8 sps:$4 sm:$0xff]   ;;  %v1412_v46 = vld [vmem:[%s1863_s5 + $0x24] ss:$8 sps:$4 sm:$0xff]  }
  0x28   :  { %250 = vmatpush1.bf16.msra.mxu0 %v1374_v23  ;;  %v1415_v47 = vld [vmem:[#allocation4 + $0x24] ss:$8 sps:$4 sm:$0xff]   ;;  %v1410_v48 = vld [vmem:[%s1863_s5 + $0x20] ss:$8 sps:$4 sm:$0xff]   ;;  %v1413_v49 = vld [vmem:[#allocation4 + $0x20] ss:$8 sps:$4 sm:$0xff]  }
  0x29   :  { %291 = vmatpush1.bf16.msra.mxu1 %v1377_v24  ;;  %555 = vmatprep.subr.bf16.mxu0 %v1382_v25  ;;  %v1418_v50 = vld [vmem:[%s1863_s5 + $0x14] ss:$8 sps:$4 sm:$0xff]   ;;  %v1421_v51 = vld [vmem:[#allocation4 + $0x14] ss:$8 sps:$4 sm:$0xff]   ;;  %v1416_v52 = vld [vmem:[%s1863_s5 + $0x10] ss:$8 sps:$4 sm:$0xff]  }
  0x2a   :  { %804 = vmatprep.subr.bf16.mxu1 %v1385_v26  ;;  %v1419_v53 = vld [vmem:[#allocation4 + $0x10] ss:$8 sps:$4 sm:$0xff]   ;;  %v1424_v54 = vld [vmem:[%s1863_s5 + $0x4] ss:$8 sps:$4 sm:$0xff]   ;;  %v1427_v55 = vld [vmem:[#allocation4 + $0x4] ss:$8 sps:$4 sm:$0xff]  }
  0x2b   :  { %1216 = vmatmul.mubr.msk.bf16.vlgmr.msra.gmra.mxu0 %vm216_vm3, %v67_v27  ;;  %v1422_v56 = vld [vmem:[%s1863_s5] ss:$8 sps:$4 sm:$0xff]   ;;  %v1425_v57 = vld [vmem:[#allocation4] ss:$8 sps:$4 sm:$0xff]   ;;  %v1430_v58 = vld [vmem:[%s1863_s5 + $0xf4] ss:$8 sps:$4 sm:$0xff]  }
  0x2c   :  { %1217 = vmatmul.mubr.msk.bf16.vlgmr.msra.gmra.mxu1 %vm216_vm3, %v67_v27  ;;  %556 = vmatpush1.bf16.msra.mxu0 %v1380_v28  ;;  %v1433_v59 = vld [vmem:[#allocation4 + $0xf4] ss:$8 sps:$4 sm:$0xff]   ;;  %v1428_v60 = vld [vmem:[%s1863_s5 + $0xf0] ss:$8 sps:$4 sm:$0xff]   ;;  %v1431_v61 = vld [vmem:[#allocation4 + $0xf0] ss:$8 sps:$4 sm:$0xff]   ;;  %v319_v28 = vlaneseq }
  0x2d   :  { %805 = vmatpush1.bf16.msra.mxu1 %v1383_v29  ;;  %557 = vmatprep.subr.bf16.mxu0 %v1388_v30  ;;  %v1436_v62 = vld [vmem:[%s1863_s5 + $0xe4] ss:$8 sps:$4 sm:$0xff]   ;;  %v1439_v63 = vld [vmem:[#allocation4 + $0xe4] ss:$8 sps:$4 sm:$0xff]   ;;  %v1434_v0 = vld [vmem:[%s1863_s5 + $0xe0] ss:$8 sps:$4 sm:$0xff]  }
  0x2e   :  { %806 = vmatprep.subr.bf16.mxu1 %v1391_v31  ;;  %v1437_v1 = vld [vmem:[#allocation4 + $0xe0] ss:$8 sps:$4 sm:$0xff]   ;;  %v1442_v2 = vld [vmem:[%s1863_s5 + $0xd4] ss:$8 sps:$4 sm:$0xff]   ;;  %v1445_v3 = vld [vmem:[#allocation4 + $0xd4] ss:$8 sps:$4 sm:$0xff]  }
  0x2f   :  { %v1440_v4 = vld [vmem:[%s1863_s5 + $0xd0] ss:$8 sps:$4 sm:$0xff]   ;;  %v1443_v5 = vld [vmem:[#allocation4 + $0xd0] ss:$8 sps:$4 sm:$0xff]   ;;  %v1448_v6 = vld [vmem:[%s1863_s5 + $0xc4] ss:$8 sps:$4 sm:$0xff]  }
  0x30   :  { %558 = vmatpush1.bf16.msra.mxu0 %v1386_v32  ;;  %v1451_v7 = vld [vmem:[#allocation4 + $0xc4] ss:$8 sps:$4 sm:$0xff]   ;;  %v1446_v8 = vld [vmem:[%s1863_s5 + $0xc0] ss:$8 sps:$4 sm:$0xff]   ;;  %v1449_v9 = vld [vmem:[#allocation4 + $0xc0] ss:$8 sps:$4 sm:$0xff]  }
  0x31   :  { %807 = vmatpush1.bf16.msra.mxu1 %v1389_v33  ;;  %559 = vmatprep.subr.bf16.mxu0 %v1394_v34  ;;  %v1454_v10 = vld [vmem:[%s1863_s5 + $0xb4] ss:$8 sps:$4 sm:$0xff]   ;;  %v1457_v11 = vld [vmem:[#allocation4 + $0xb4] ss:$8 sps:$4 sm:$0xff]   ;;  %v1452_v12 = vld [vmem:[%s1863_s5 + $0xb0] ss:$8 sps:$4 sm:$0xff]  }
  0x32   :  { %808 = vmatprep.subr.bf16.mxu1 %v1397_v35  ;;  %v1455_v13 = vld [vmem:[#allocation4 + $0xb0] ss:$8 sps:$4 sm:$0xff]   ;;  %v1460_v14 = vld [vmem:[%s1863_s5 + $0xa4] ss:$8 sps:$4 sm:$0xff]   ;;  %v1463_v15 = vld [vmem:[#allocation4 + $0xa4] ss:$8 sps:$4 sm:$0xff]  }
  0x33   :  { %v1458_v16 = vld [vmem:[%s1863_s5 + $0xa0] ss:$8 sps:$4 sm:$0xff]   ;;  %v1461_v17 = vld [vmem:[#allocation4 + $0xa0] ss:$8 sps:$4 sm:$0xff]   ;;  %v1466_v18 = vld [vmem:[%s1863_s5 + $0x94] ss:$8 sps:$4 sm:$0xff]  }
  0x34   :  { %560 = vmatpush1.bf16.msra.mxu0 %v1392_v36  ;;  %v1469_v19 = vld [vmem:[#allocation4 + $0x94] ss:$8 sps:$4 sm:$0xff]   ;;  %v1464_v20 = vld [vmem:[%s1863_s5 + $0x90] ss:$8 sps:$4 sm:$0xff]   ;;  %v1467_v21 = vld [vmem:[#allocation4 + $0x90] ss:$8 sps:$4 sm:$0xff]  }
  0x35   :  { %809 = vmatpush1.bf16.msra.mxu1 %v1395_v37  ;;  %561 = vmatprep.subr.bf16.mxu0 %v1400_v38  ;;  %v1472_v22 = vld [vmem:[%s1863_s5 + $0x84] ss:$8 sps:$4 sm:$0xff]   ;;  %v1475_v23 = vld [vmem:[#allocation4 + $0x84] ss:$8 sps:$4 sm:$0xff]   ;;  %v1470_v24 = vld [vmem:[%s1863_s5 + $0x80] ss:$8 sps:$4 sm:$0xff]  }
  0x36   :  { %810 = vmatprep.subr.bf16.mxu1 %v1403_v39  ;;  %v1473_v25 = vld [vmem:[#allocation4 + $0x80] ss:$8 sps:$4 sm:$0xff]   ;;  %v320_v29 = vshrl.u32 %v319_v28, 7  ;;  %v317_v38 = vld [vmem:[%s1862_s4] sm:$0xf]  ;;  %vm1192_vm4 = vcmask 11264  }
  0x37   :  { %v1476_v26 = vld [vmem:[%s1867_s9 + $0x78] sm:$0xff]   ;;  %v1499_v28 = vld [vmem:[%s1867_s9 + $0x90] sm:$0xff]  }
  0x38   :  { %562 = vmatpush1.bf16.msra.mxu0 %v1398_v40  ;;  %v1477_v27 = vld [vmem:[%s1867_s9 + $0xf8] sm:$0xff]   ;;  %v1743_v34 = vsub.s32 0, %v320_v29  ;;  %v329_v35 = vsub.s32 2, %v320_v29  ;;  %v1748_v39 = vsub.s32 1, %v320_v29  ;;  %v333_v40 = vsub.s32 3, %v320_v29  ;;  %v1500_v29 = vld [vmem:[%s1867_s9 + $0x48] sm:$0xff]  }
  0x39   :  { %811 = vmatpush1.bf16.msra.mxu1 %v1401_v41  ;;  %563 = vmatprep.subr.bf16.mxu0 %v1406_v42 }
  0x3a   :  { %812 = vmatprep.subr.bf16.mxu1 %v1409_v43  ;;  %v322_v43 = vrot.slane %v317_v38, %v1743_v34 }
  0x3c   :  { %564 = vmatpush1.bf16.msra.mxu0 %v1404_v44  ;;  %v330_v44 = vrot.slane %v317_v38, %v329_v35  ;;  %v1505_v35 = vld [vmem:[%s1867_s9 + $0xc0] sm:$0xff]  }
  0x3d   :  { %813 = vmatpush1.bf16.msra.mxu1 %v1407_v45  ;;  %565 = vmatprep.subr.bf16.mxu0 %v1412_v46 }
  0x3e   :  { %814 = vmatprep.subr.bf16.mxu1 %v1415_v47 }
  0x40   :  { %566 = vmatpush1.bf16.msra.mxu0 %v1410_v48 }
  0x41   :  { %815 = vmatpush1.bf16.msra.mxu1 %v1413_v49  ;;  %567 = vmatprep.subr.bf16.mxu0 %v1418_v50  ;;  %v326_v49 = vrot.slane %v317_v38, %v1748_v39  ;;  %v334_v50 = vrot.slane %v317_v38, %v333_v40  ;;  %v383_v38 = vld [vmem:[%s1864_s6] sm:$0x3] }
  0x42   :  { %816 = vmatprep.subr.bf16.mxu1 %v1421_v51  ;;  %v632_v40 = vld [vmem:[%s1866_s8] sm:$0x3] }
  0x44   :  { %568 = vmatpush1.bf16.msra.mxu0 %v1416_v52 }
  0x45   :  { %817 = vmatpush1.bf16.msra.mxu1 %v1419_v53  ;;  %569 = vmatprep.subr.bf16.mxu0 %v1424_v54 }
  0x46   :  { %818 = vmatprep.subr.bf16.mxu1 %v1427_v55 }
  0x48   :  { %570 = vmatpush1.bf16.msra.mxu0 %v1422_v56 }
  0x49   :  { %819 = vmatpush1.bf16.msra.mxu1 %v1425_v57  ;;  %571 = vmatprep.subr.bf16.mxu0 %v1430_v58 }
  0x4a   :  { %820 = vmatprep.subr.bf16.mxu1 %v1433_v59 }
  0x4c   :  { %572 = vmatpush2.bf16.msra.mxu0 %v1428_v60 }
  0x4d   :  { %821 = vmatpush2.bf16.msra.mxu1 %v1431_v61  ;;  %573 = vmatprep.subr.bf16.mxu0 %v1436_v62 }
  0x4e   :  { %822 = vmatprep.subr.bf16.mxu1 %v1439_v63 }
  0x50   :  { %574 = vmatpush2.bf16.msra.mxu0 %v1434_v0 }
  0x51   :  { %823 = vmatpush2.bf16.msra.mxu1 %v1437_v1  ;;  %575 = vmatprep.subr.bf16.mxu0 %v1442_v2 }
  0x52   :  { %824 = vmatprep.subr.bf16.mxu1 %v1445_v3 }
  0x54   :  { %576 = vmatpush2.bf16.msra.mxu0 %v1440_v4 }
  0x55   :  { %825 = vmatpush2.bf16.msra.mxu1 %v1443_v5  ;;  %577 = vmatprep.subr.bf16.mxu0 %v1448_v6  ;;  %v1478_v5 = vld [vmem:[%s1867_s9 + $0x38] sm:$0xff]  }
  0x56   :  { %826 = vmatprep.subr.bf16.mxu1 %v1451_v7  ;;  %v1479_v6 = vld [vmem:[%s1867_s9 + $0xb8] sm:$0xff]  }
  0x58   :  { %578 = vmatpush2.bf16.msra.mxu0 %v1446_v8 }
  0x59   :  { %827 = vmatpush2.bf16.msra.mxu1 %v1449_v9  ;;  %579 = vmatprep.subr.bf16.mxu0 %v1454_v10  ;;  %v1480_v9 = vld [vmem:[%s1867_s9 + $0x70] sm:$0xff]  }
  0x5a   :  { %828 = vmatprep.subr.bf16.mxu1 %v1457_v11  ;;  %v1481_v10 = vld [vmem:[%s1867_s9 + $0xf0] sm:$0xff]  }
  0x5b   :  { %v1482_v11 = vld [vmem:[%s1867_s9 + $0x30] sm:$0xff]  }
  0x5c   :  { %580 = vmatpush2.bf16.msra.mxu0 %v1452_v12  ;;  %v1483_v12 = vld [vmem:[%s1867_s9 + $0xb0] sm:$0xff]  }
  0x5d   :  { %829 = vmatpush2.bf16.msra.mxu1 %v1455_v13  ;;  %581 = vmatprep.subr.bf16.mxu0 %v1460_v14  ;;  %v1484_v13 = vld [vmem:[%s1867_s9 + $0x68] sm:$0xff]  }
  0x5e   :  { %830 = vmatprep.subr.bf16.mxu1 %v1463_v15  ;;  %v1485_v14 = vld [vmem:[%s1867_s9 + $0xe8] sm:$0xff]  }
  0x5f   :  { %v1486_v15 = vld [vmem:[%s1867_s9 + $0x28] sm:$0xff]  }
  0x60   :  { %582 = vmatpush2.bf16.msra.mxu0 %v1458_v16  ;;  %v1487_v16 = vld [vmem:[%s1867_s9 + $0xa8] sm:$0xff]  }
  0x61   :  { %831 = vmatpush2.bf16.msra.mxu1 %v1461_v17  ;;  %583 = vmatprep.subr.bf16.mxu0 %v1466_v18  ;;  %v1488_v17 = vld [vmem:[%s1867_s9 + $0x60] sm:$0xff]  }
  0x62   :  { %832 = vmatprep.subr.bf16.mxu1 %v1469_v19  ;;  %v1489_v18 = vld [vmem:[%s1867_s9 + $0xe0] sm:$0xff]  }
  0x63   :  { %v1490_v19 = vld [vmem:[%s1867_s9 + $0x20] sm:$0xff]  }
  0x64   :  { %584 = vmatpush2.bf16.msra.mxu0 %v1464_v20  ;;  %v1491_v20 = vld [vmem:[%s1867_s9 + $0xa0] sm:$0xff]  }
  0x65   :  { %833 = vmatpush2.bf16.msra.mxu1 %v1467_v21  ;;  %585 = vmatprep.subr.bf16.mxu0 %v1472_v22  ;;  %v1492_v21 = vld [vmem:[%s1867_s9 + $0x58] sm:$0xff]  }
  0x66   :  { %834 = vmatprep.subr.bf16.mxu1 %v1475_v23  ;;  %v1493_v22 = vld [vmem:[%s1867_s9 + $0xd8] sm:$0xff]  }
  0x67   :  { %v1494_v23 = vld [vmem:[%s1867_s9 + $0x18] sm:$0xff]  }
  0x68   :  { %586 = vmatpush2.bf16.msra.mxu0 %v1470_v24  ;;  %v1495_v24 = vld [vmem:[%s1867_s9 + $0x98] sm:$0xff]  }
  0x69   :  { %835 = vmatpush2.bf16.msra.mxu1 %v1473_v25  ;;  %1315 = vmatprep.subr.bf16.mxu0 %v1476_v26  ;;  %v1496_v25 = vld [vmem:[%s1867_s9 + $0x50] sm:$0xff]  }
  0x6a   :  { %1337 = vmatprep.subr.bf16.mxu1 %v1477_v27  ;;  %v1497_v26 = vld [vmem:[%s1867_s9 + $0xd0] sm:$0xff]  }
  0x6b   :  { %v1498_v27 = vld [vmem:[%s1867_s9 + $0x10] sm:$0xff]  }
  0xe3   :  { %v138_v30 = vpop.f32.mrf.mxu0 }
  0xe4   :  { %v179_v31 = vpop.f32.mrf.mxu1 }
  0xe5   :  { %v140_v32 = vpop.f32.mrf.mxu0 }
  0xe6   :  { %v181_v33 = vpop.f32.mrf.mxu1 }
  0xe7   :  { %v142_v36 = vpop.f32.mrf.mxu0 }
  0xe8   :  { %v183_v37 = vpop.f32.mrf.mxu1  ;;  %v1506_v36 = vld [vmem:[%s1867_s9] sm:$0xff]  }
  0xe9   :  { %v143_v41 = vpop.f32.mrf.mxu0  ;;  %v1507_v37 = vld [vmem:[%s1867_s9 + $0x80] sm:$0xff]  }
  0xea   :  { %v184_v42 = vpop.f32.mrf.mxu1  ;;  %v388_v41 = vrot.slane %v383_v38, %v1743_v34 }
  0xeb   :  { %v269_v45 = vpop.f32.mrf.mxu0  ;;  %v637_v42 = vrot.slane %v632_v40, %v1743_v34 }
  0xec   :  { %v310_v46 = vpop.f32.mrf.mxu1  ;;  %v270_v47 = vadd.f32 %v269_v45, %v138_v30  ;;  %v1501_v30 = vld [vmem:[%s1867_s9 + $0xc8] sm:$0xff]  }
  0xed   :  { %v311_v48 = vadd.f32 %v310_v46, %v179_v31  ;;  %v271_v51 = vpop.f32.mrf.mxu0  ;;  %v1502_v31 = vld [vmem:[%s1867_s9 + $0x8] sm:$0xff]  }
  0xee   :  { %v312_v52 = vpop.f32.mrf.mxu1  ;;  %v339_v53 = vadd.f32 %v322_v43, %v270_v47  ;;  %v272_v55 = vadd.f32 %v271_v51, %v140_v32  ;;  %v1503_v32 = vld [vmem:[%s1867_s9 + $0x88] sm:$0xff]   ;;  %v392_v43 = vrot.slane %v383_v38, %v1748_v39 }
  0xef   :  { %v341_v54 = vadd.f32 %v330_v44, %v311_v48  ;;  %v313_v56 = vadd.f32 %v312_v52, %v181_v33  ;;  %v273_v57 = vpop.f32.mrf.mxu0  ;;  %v1504_v33 = vld [vmem:[%s1867_s9 + $0x40] sm:$0xff]   ;;  %v641_v44 = vrot.slane %v632_v40, %v1748_v39 }
  0xf0   :  { %v314_v58 = vpop.f32.mrf.mxu1  ;;  %v340_v59 = vadd.f32 %v326_v49, %v272_v55  ;;  %v343_v61 = vmax.f32 %v339_v53, 0.0 }
  0xf1   :  { %v342_v60 = vadd.f32 %v334_v50, %v313_v56  ;;  %v345_v62 = vmax.f32 %v341_v54, 0.0  ;;  %v274_v63 = vpop.f32.mrf.mxu0 }
  0xf2   :  { %v315_v0 = vpop.f32.mrf.mxu1  ;;  %v344_v1 = vmax.f32 %v340_v59, 0.0  ;;  %v347_v7 = vpack.c.bf16 %v343_v61, %v343_v61 }
  0xf3   :  { %v346_v2 = vmax.f32 %v342_v60, 0.0  ;;  %v349_v8 = vpack.c.bf16 %v345_v62, %v345_v62 }
  0xf4   :  { %v348_v3 = vpack.c.bf16 %v344_v1, %v344_v1  ;;  %v1282_v1 = vld [vmem:[%s1868_s10] ss:$0 sm:$0xff] }
  0xf5   :  { %v350_v4 = vpack.c.bf16 %v346_v2, %v346_v2 }
  0xf6   :  { %587 = vmatprep.mubr.bf16.mxu0 %v348_v3 }
  0xf7   :  { %836 = vmatprep.mubr.bf16.mxu1 %v350_v4  ;;  %588 = vmatmul.mubr.bf16.vlgmr.msra.gmra.mxu0 %v347_v7 }
  0xf8   :  { %837 = vmatmul.mubr.bf16.vlgmr.msra.gmra.mxu1 %v349_v8  ;;  %1316 = vmatpush3.bf16.msra.mxu0 %v1478_v5 }
  0xf9   :  { %1338 = vmatpush3.bf16.msra.mxu1 %v1479_v6  ;;  %1317 = vmatprep.subr.bf16.mxu0 %v1480_v9 }
  0xfa   :  { %1339 = vmatprep.subr.bf16.mxu1 %v1481_v10 }
  0xfc   :  { %1318 = vmatpush3.bf16.msra.mxu0 %v1482_v11 }
  0xfd   :  { %1340 = vmatpush3.bf16.msra.mxu1 %v1483_v12  ;;  %1319 = vmatprep.subr.bf16.mxu0 %v1484_v13 }
  0xfe   :  { %1341 = vmatprep.subr.bf16.mxu1 %v1485_v14 }
 0x100   :  { %1320 = vmatpush3.bf16.msra.mxu0 %v1486_v15 }
 0x101   :  { %1342 = vmatpush3.bf16.msra.mxu1 %v1487_v16  ;;  %1321 = vmatprep.subr.bf16.mxu0 %v1488_v17 }
 0x102   :  { %1343 = vmatprep.subr.bf16.mxu1 %v1489_v18 }
 0x104   :  { %1322 = vmatpush3.bf16.msra.mxu0 %v1490_v19 }
 0x105   :  { %1344 = vmatpush3.bf16.msra.mxu1 %v1491_v20  ;;  %1323 = vmatprep.subr.bf16.mxu0 %v1492_v21 }
 0x106   :  { %1345 = vmatprep.subr.bf16.mxu1 %v1493_v22 }
 0x108   :  { %1324 = vmatpush3.bf16.msra.mxu0 %v1494_v23 }
 0x109   :  { %1346 = vmatpush3.bf16.msra.mxu1 %v1495_v24  ;;  %1325 = vmatprep.subr.bf16.mxu0 %v1496_v25 }
 0x10a   :  { %1347 = vmatprep.subr.bf16.mxu1 %v1497_v26 }
 0x10c   :  { %1326 = vmatpush3.bf16.msra.mxu0 %v1498_v27 }
 0x10d   :  { %1348 = vmatpush3.bf16.msra.mxu1 %v1499_v28  ;;  %1327 = vmatprep.subr.bf16.mxu0 %v1500_v29 }
 0x10e   :  { %1349 = vmatprep.subr.bf16.mxu1 %v1501_v30 }
 0x110   :  { %1328 = vmatpush3.bf16.msra.mxu0 %v1502_v31 }
 0x111   :  { %1350 = vmatpush3.bf16.msra.mxu1 %v1503_v32  ;;  %1329 = vmatprep.subr.bf16.mxu0 %v1504_v33 }
 0x112   :  { %1351 = vmatprep.subr.bf16.mxu1 %v1505_v35 }
 0x114   :  { %1330 = vmatpush3.bf16.msra.mxu0 %v1506_v36 }
 0x115   :  { %1352 = vmatpush3.bf16.msra.mxu1 %v1507_v37 }
 0x1b7   :  { %v589_v45 = vpop.f32.mrf.mxu0 }
 0x1b8   :  { %v838_v46 = vpop.f32.mrf.mxu1  ;;  %v590_v47 = vadd.f32 %v589_v45, %v388_v41 }
 0x1b9   :  { %v839_v48 = vadd.f32 %v838_v46, %v637_v42  ;;  %v591_v49 = vpop.f32.mrf.mxu0 }
 0x1ba   :  { %v840_v50 = vpop.f32.mrf.mxu1  ;;  %v592_v51 = vadd.f32 %v591_v49, %v392_v43  ;;  %v596_v53 = vmax.f32 %v590_v47, 0.0 }
 0x1bb   :  { %v841_v52 = vadd.f32 %v840_v50, %v641_v44  ;;  %v845_v54 = vmax.f32 %v839_v48, 0.0  ;;  %v593_v55 = vpop.f32.mrf.mxu0 }
 0x1bc   :  { %v842_v56 = vpop.f32.mrf.mxu1  ;;  %v597_v57 = vmax.f32 %v592_v51, 0.0  ;;  %v598_v62 = vpack.c.bf16 %v596_v53, %v596_v53 }
 0x1bd   :  { %v846_v58 = vmax.f32 %v841_v52, 0.0  ;;  %v594_v59 = vpop.f32.mrf.mxu0  ;;  %v847_v39 = vpack.c.bf16 %v845_v54, %v845_v54 }
 0x1be   :  { %v843_v34 = vpop.f32.mrf.mxu1  ;;  %v599_v60 = vpack.c.bf16 %v597_v57, %v597_v57 }
 0x1bf   :  { %v848_v61 = vpack.c.bf16 %v846_v58, %v846_v58 }
 0x1c0   :  { %1144 = vmatprep.mubr.bf16.mxu0 %v599_v60 }
 0x1c1   :  { %1184 = vmatprep.mubr.bf16.mxu1 %v848_v61  ;;  %1145 = vmatmul.mubr.bf16.vlgmr.msra.gmra.mxu0 %v598_v62 }
 0x1c2   :  { %1185 = vmatmul.mubr.bf16.vlgmr.msra.gmra.mxu1 %v847_v39 }
 0x281   :  { %v1331_v63 = vpop.f32.mrf.mxu0 }
 0x282   :  { %v1353_v0 = vpop.f32.mrf.mxu1 }
 0x283   :  { %v1332_v2 = vpop.f32.mrf.mxu0 }
 0x284   :  { %v1354_v3 = vpop.f32.mrf.mxu1  ;;  %v1333_v4 = vadd.f32 %v1332_v2, %v1331_v63 }
 0x285   :  { %v1334_v5 = vpop.f32.mrf.mxu0  ;;  %v1355_v8 = vadd.f32 %v1354_v3, %v1353_v0 }
 0x286   :  { %v1356_v6 = vpop.f32.mrf.mxu1  ;;  %v1147_v7 = vadd.f32 %v1333_v4, %v1282_v1 }
 0x287   :  { %v1335_v9 = vpop.f32.mrf.mxu0 }
 0x288   :  { %v1357_v10 = vpop.f32.mrf.mxu1  ;;  %v1187_v11 = vadd.f32 %v1355_v8, %v1147_v7 }
 0x28a   :  { %1193 = vst.msk [vmem:[%s1869_s11] sm:$0xf] %vm1192_vm4, %v1187_v11 }
 0x28b   :  { %1198 = vsyncpa [#allocation3], 1 }
 0x28c   :  { %1199 = vsyncpa [#allocation5], 1 }

</bundles_post_ra>
